<compile_context>
chip_gen: v7x
topology: tpu7x:2x2x1
jax: 0.10.0
libtpu: 0.0.40
codegen_flags: <defaults>
</compile_context>

<pallas_src>
import jax
import jax.numpy as jnp
import numpy as np
from jax import lax
from jax.experimental import pallas as pl
from jax.experimental.pallas import tpu as pltpu

K = 5          # conv kernel size
C_IN = 6
C_OUT = 16
CKK = C_IN * K * K                      # 150 -- kept unpadded


def _round_up(x, m):
    return (x + m - 1) // m * m


def _c2_kernel(p_ref, w_ref, b_ref, o_ref):
    """One lane-tile of output columns.

    p_ref: (4, CKK, MT)  bf16  -- axis 0 is the 2x2 pool-window offset q = dh*2+dw
    w_ref: (C_OUT, CKK)  bf16
    b_ref: (C_OUT, 1)    f32
    o_ref: (C_OUT, MT)   f32   -- lane-dense output tile
    """
    w = w_ref[...]
    # Conv restricted to pool-window offset q; elementwise max over q == 2x2 max-pool.
    m = jnp.dot(w, p_ref[0], preferred_element_type=jnp.float32)
    for q in range(1, 4):
        m = jnp.maximum(m, jnp.dot(w, p_ref[q], preferred_element_type=jnp.float32))
    # Bias is identical across pool-window offsets and ReLU is monotone, so
    # max_q relu(x_q + b) == relu(max_q(x_q) + b): one bias add + one ReLU per tile.
    o_ref[...] = jnp.maximum(m + b_ref[...], 0.0).astype(o_ref.dtype)


@jax.jit
def c2_forward(x, w, b):
    """PyTorch-equivalent C2.forward.
    x: (N, 6, H, W) NCHW f32, w: (16, 6, 5, 5) OIHW, b: (16,).
    Returns: (N, 16, PH, PW) NCHW f32."""
    N, C, H, W = x.shape
    OH, OW = H - K + 1, W - K + 1
    # TODO(synk): odd conv-output sizes (MaxPool2d floor behavior) are not handled;
    # the 14x14 LeNet case gives even OH/OW.
    assert OH % 2 == 0 and OW % 2 == 0, "2x2/stride-2 maxpool needs even conv output"
    PH, PW = OH // 2, OW // 2
    M = N * PH * PW

    xb = x.astype(jnp.bfloat16)
    wb = w.astype(jnp.bfloat16)

    # Single fused im2col: (N, C*K*K, OH, OW), feature order c*K*K + kh*K + kw
    # (channel-major), which matches the OIHW weight flatten below.
    pat = lax.conv_general_dilated_patches(
        xb, filter_shape=(K, K), window_strides=(1, 1), padding="VALID",
        dimension_numbers=("NCHW", "OIHW", "NCHW"))

    # One reshape + one transpose: split the 2x2 pool-window offsets (dh, dw) out of
    # (OH, OW) and fold (n, ph, pw) into one big lane axis M, keeping CKK on sublanes.
    pat = pat.reshape(N, CKK, PH, 2, PW, 2)
    p = jnp.transpose(pat, (3, 5, 1, 0, 2, 4)).reshape(4, CKK, M)   # (4, CKK, M)

    # Pad M only to a multiple of 128 (lane-dense tiles); CKK stays 150.
    M_pad = _round_up(M, 128)
    if M_pad != M:
        p = jnp.pad(p, ((0, 0), (0, 0), (0, M_pad - M)))

    # Lane-tile width: as large as possible (amortize ~0.35us/step grid overhead, big
    # DMA rows), capped at 2048; once M is non-trivial keep >= 2 tiles so v7x's two
    # TensorCores both get work on the "parallel" grid axis.
    if M_pad <= 256:
        MT = M_pad
    else:
        MT = min(_round_up(pl.cdiv(M_pad, 2), 128), 2048)
    num_tiles = pl.cdiv(M_pad, MT)

    w_mat = wb.reshape(C_OUT, CKK)
    b_mat = b.astype(jnp.float32).reshape(C_OUT, 1)

    out = pl.pallas_call(
        _c2_kernel,
        out_shape=jax.ShapeDtypeStruct((C_OUT, M_pad), jnp.float32),
        grid_spec=pltpu.PrefetchScalarGridSpec(
            num_scalar_prefetch=0,
            grid=(num_tiles,),
            in_specs=[
                pl.BlockSpec((4, CKK, MT), lambda g: (0, 0, g)),
                pl.BlockSpec((C_OUT, CKK), lambda g: (0, 0)),
                pl.BlockSpec((C_OUT, 1), lambda g: (0, 0)),
            ],
            out_specs=pl.BlockSpec((C_OUT, MT), lambda g: (0, g)),
        ),
        compiler_params=pltpu.CompilerParams(dimension_semantics=("parallel",)),
    )(p, w_mat, b_mat)

    # (16, M_pad) -> drop padding -> (N, 16, PH, PW) back to PyTorch NCHW.
    return out[:, :M].reshape(C_OUT, N, PH, PW).transpose(1, 0, 2, 3)


if __name__ == "__main__":
    key = jax.random.PRNGKey(0)
    kx, kw, kb = jax.random.split(key, 3)

    # LeNet C2 input: (N, 6, 14, 14)
    N, H, W = 2, 14, 14
    x = jax.random.normal(kx, (N, C_IN, H, W), dtype=jnp.float32)

    # Deterministic parameter init (PyTorch-style uniform bounds), shapes from nn.Conv2d(6,16,5).
    fan_in = C_IN * K * K
    bound = 1.0 / np.sqrt(fan_in)
    w = jax.random.uniform(kw, (C_OUT, C_IN, K, K), jnp.float32, -bound, bound)
    b = jax.random.uniform(kb, (C_OUT,), jnp.float32, -bound, bound)

    out = jax.block_until_ready(c2_forward(x, w, b))

    # Pure-JAX reference on the same bf16-rounded operands (the kernel matmuls run in
    # bf16 on the MXU with f32 accumulation), so differences are only accumulation order.
    xr = x.astype(jnp.bfloat16).astype(jnp.float32)
    wr = w.astype(jnp.bfloat16).astype(jnp.float32)
    conv = lax.conv_general_dilated(
        xr, wr, window_strides=(1, 1), padding="VALID",
        dimension_numbers=("NCHW", "OIHW", "NCHW"))
    ref = jnp.maximum(conv + b[None, :, None, None], 0.0)
    ref = lax.reduce_window(ref, -jnp.inf, lax.max,
                            (1, 1, 2, 2), (1, 1, 2, 2), "VALID")

    assert out.shape == ref.shape == (N, C_OUT, 5, 5), (out.shape, ref.shape)
    np.testing.assert_allclose(np.asarray(out), np.asarray(ref), rtol=1e-3, atol=1e-3)
    print("KERNEL_OK")
</pallas_src>

<mosaic_0001>
module attributes {stable_mosaic.version = 11 : i64} {
  func.func @_c2_kernel(%arg0: i32, %arg1: memref<4x150x128xbf16, #tpu.memory_space<vmem>>, %arg2: memref<16x150xbf16, #tpu.memory_space<vmem>>, %arg3: memref<16x1xf32, #tpu.memory_space<vmem>>, %arg4: memref<16x128xf32, #tpu.memory_space<vmem>>) attributes {dimension_semantics = [#tpu.dimension_semantics<parallel>], iteration_bounds = array<i64: 1>, scalar_prefetch = 0 : i64, scratch_operands = 0 : i64, tpu.core_type = #tpu.core_type<tc>, window_params = [{transform_indices = @transform_0, window_bounds = array<i64: 4, 150, 128>}, {pipeline_mode = #tpu.pipeline_mode<synchronous>, transform_indices = @transform_1, window_bounds = array<i64: 16, 150>}, {pipeline_mode = #tpu.pipeline_mode<synchronous>, transform_indices = @transform_2, window_bounds = array<i64: 16, 1>}, {transform_indices = @transform_3, window_bounds = array<i64: 16, 128>}]} {
    %c0 = arith.constant 0 : index
    %c0_0 = arith.constant 0 : index
    %0 = vector.load %arg2[%c0, %c0_0] : memref<16x150xbf16, #tpu.memory_space<vmem>>, vector<16x150xbf16>
    %c0_1 = arith.constant 0 : index
    %c0_2 = arith.constant 0 : index
    %c0_3 = arith.constant 0 : index
    %1 = vector.load %arg1[%c0_1, %c0_2, %c0_3] : memref<4x150x128xbf16, #tpu.memory_space<vmem>>, vector<1x150x128xbf16>
    %2 = vector.shape_cast %1 : vector<1x150x128xbf16> to vector<150x128xbf16>
    %cst = arith.constant dense<0.000000e+00> : vector<16x128xf32>
    %3 = tpu.matmul %0, %2, %cst {dimension_numbers = #tpu.dot_dimension_numbers<[1], [0], [0], [1], [0, 0, 1, 1], [], []>} : vector<16x150xbf16>, vector<150x128xbf16>, vector<16x128xf32> -> vector<16x128xf32>
    %c1 = arith.constant 1 : index
    %c0_4 = arith.constant 0 : index
    %c0_5 = arith.constant 0 : index
    %4 = vector.load %arg1[%c1, %c0_4, %c0_5] : memref<4x150x128xbf16, #tpu.memory_space<vmem>>, vector<1x150x128xbf16>
    %5 = vector.shape_cast %4 : vector<1x150x128xbf16> to vector<150x128xbf16>
    %cst_6 = arith.constant dense<0.000000e+00> : vector<16x128xf32>
    %6 = tpu.matmul %0, %5, %cst_6 {dimension_numbers = #tpu.dot_dimension_numbers<[1], [0], [0], [1], [0, 0, 1, 1], [], []>} : vector<16x150xbf16>, vector<150x128xbf16>, vector<16x128xf32> -> vector<16x128xf32>
    %7 = arith.maximumf %3, %6 : vector<16x128xf32>
    %c2 = arith.constant 2 : index
    %c0_7 = arith.constant 0 : index
    %c0_8 = arith.constant 0 : index
    %8 = vector.load %arg1[%c2, %c0_7, %c0_8] : memref<4x150x128xbf16, #tpu.memory_space<vmem>>, vector<1x150x128xbf16>
    %9 = vector.shape_cast %8 : vector<1x150x128xbf16> to vector<150x128xbf16>
    %cst_9 = arith.constant dense<0.000000e+00> : vector<16x128xf32>
    %10 = tpu.matmul %0, %9, %cst_9 {dimension_numbers = #tpu.dot_dimension_numbers<[1], [0], [0], [1], [0, 0, 1, 1], [], []>} : vector<16x150xbf16>, vector<150x128xbf16>, vector<16x128xf32> -> vector<16x128xf32>
    %11 = arith.maximumf %7, %10 : vector<16x128xf32>
    %c3 = arith.constant 3 : index
    %c0_10 = arith.constant 0 : index
    %c0_11 = arith.constant 0 : index
    %12 = vector.load %arg1[%c3, %c0_10, %c0_11] : memref<4x150x128xbf16, #tpu.memory_space<vmem>>, vector<1x150x128xbf16>
    %13 = vector.shape_cast %12 : vector<1x150x128xbf16> to vector<150x128xbf16>
    %cst_12 = arith.constant dense<0.000000e+00> : vector<16x128xf32>
    %14 = tpu.matmul %0, %13, %cst_12 {dimension_numbers = #tpu.dot_dimension_numbers<[1], [0], [0], [1], [0, 0, 1, 1], [], []>} : vector<16x150xbf16>, vector<150x128xbf16>, vector<16x128xf32> -> vector<16x128xf32>
    %15 = arith.maximumf %11, %14 : vector<16x128xf32>
    %c0_13 = arith.constant 0 : index
    %c0_14 = arith.constant 0 : index
    %16 = vector.load %arg3[%c0_13, %c0_14] : memref<16x1xf32, #tpu.memory_space<vmem>>, vector<16x1xf32>
    %17 = vector.broadcast %16 : vector<16x1xf32> to vector<16x128xf32>
    %18 = arith.addf %15, %17 : vector<16x128xf32>
    %cst_15 = arith.constant 0.000000e+00 : f32
    %19 = vector.broadcast %cst_15 : f32 to vector<16x128xf32>
    %20 = arith.maximumf %18, %19 : vector<16x128xf32>
    %c0_16 = arith.constant 0 : index
    %c0_17 = arith.constant 0 : index
    %21 = vector.load %arg4[%c0_16, %c0_17] : memref<16x128xf32, #tpu.memory_space<vmem>>, vector<16x128xf32>
    tpu.vector_store %arg4[%c0_16, %c0_17], %20 {strides = array<i32>} : memref<16x128xf32, #tpu.memory_space<vmem>>, vector<16x128xf32>,
    return
  }
  func.func @transform_0(%arg0: i32) -> (i32, i32, i32) {
    %c0_i32 = arith.constant 0 : i32
    %c0_i32_0 = arith.constant 0 : i32
    %c0_i32_1 = arith.constant 0 : i32
    return %c0_i32, %c0_i32_0, %arg0 : i32, i32, i32
  }
  func.func @transform_1(%arg0: i32) -> (i32, i32) {
    %c0_i32 = arith.constant 0 : i32
    %c0_i32_0 = arith.constant 0 : i32
    %c0_i32_1 = arith.constant 0 : i32
    return %c0_i32, %c0_i32_0 : i32, i32
  }
  func.func @transform_2(%arg0: i32) -> (i32, i32) {
    %c0_i32 = arith.constant 0 : i32
    %c0_i32_0 = arith.constant 0 : i32
    %c0_i32_1 = arith.constant 0 : i32
    return %c0_i32, %c0_i32_0 : i32, i32
  }
  func.func @transform_3(%arg0: i32) -> (i32, i32) {
    %c0_i32 = arith.constant 0 : i32
    %c0_i32_0 = arith.constant 0 : i32
    return %c0_i32, %arg0 : i32, i32
  }
}

</mosaic_0001>

<bundles_post_ra>
// kernel: c2_forward.1
= control target key start
LH: loop header
LB: loop body
LE: loop exit
PB: predicated region body
PF: predicated region fallthrough
CT: control target
= control target key end

     0   :  { %v690_v0 = vmov 0   ;;  %vm102_vm0 = vcmask 179200   ;;  %vm106_vm1 = vcmask 1042432   ;;  %s904_s0 = inlined_call_operand.vmem [shape: bf16[4,150,128], index: 0, kind: input, shape index: {}]   ;;  %s905_s1 = inlined_call_operand.vmem [shape: bf16[16,150], index: 1, kind: input, shape index: {}]   ;;  %s906_s2 = inlined_call_operand.vmem [shape: f32[16,1], index: 2, kind: input, shape index: {}]   ;;  %s907_s3 = inlined_call_operand.vmem [shape: f32[16,128], index: 3, kind: output, shape index: {}]  }
   0x1   :  { %110 = vmatprep.subr.bf16.mxu0 %v690_v0  ;;  %231 = vmatprep.subr.bf16.mxu1 %v690_v0  ;;  %v647_v1 = vld [vmem:[%s904_s0] sm:$0xff]   ;;  %v648_v2 = vld [vmem:[%s904_s0 + $0x4c] sm:$0xff]   ;;  %v650_v4 = vld [vmem:[%s904_s0 + $0x54] sm:$0xff]  }
   0x2   :  { %646 = vset.pattern.permute.xlu0 %v690_v0  ;;  %111 = vmatpush1.bf16.msra.mxu0 %v647_v1  ;;  %v649_v3 = vld [vmem:[%s904_s0 + $0x8] sm:$0xff]   ;;  %v651_v5 = vld [vmem:[%s904_s0 + $0x10] sm:$0xff]   ;;  %v652_v6 = vld [vmem:[%s904_s0 + $0x5c] sm:$0xff]  }
   0x3   :  { %232 = vmatpush1.bf16.msra.mxu1 %v648_v2  ;;  %112 = vmatprep.subr.bf16.mxu0 %v690_v0  ;;  %v653_v7 = vld [vmem:[%s904_s0 + $0x18] sm:$0xff]   ;;  %v654_v8 = vld [vmem:[%s904_s0 + $0x64] sm:$0xff]   ;;  %v656_v10 = vld [vmem:[%s904_s0 + $0x6c] sm:$0xff]  }
   0x4   :  { %233 = vmatprep.subr.bf16.mxu1 %v690_v0  ;;  %v655_v9 = vld [vmem:[%s904_s0 + $0x20] sm:$0xff]   ;;  %v657_v11 = vld [vmem:[%s904_s0 + $0x28] sm:$0xff]   ;;  %v658_v12 = vld [vmem:[%s904_s0 + $0x74] sm:$0xff]  }
   0x5   :  { %v667_v13 = vld [vmem:[%s905_s1 + $0x4] ss:$8 sps:$4 sm:$0xff]   ;;  %v659_v14 = vld [vmem:[%s904_s0 + $0x30] sm:$0xff]   ;;  %v660_v15 = vld [vmem:[%s904_s0 + $0x7c] sm:$0xff]  }
   0x6   :  { %113 = vmatpush1.bf16.msra.mxu0 %v649_v3  ;;  %554 = vmatprep.mubr.msk.bf16.mxu0 %vm102_vm0, %v667_v13  ;;  %v661_v16 = vld [vmem:[%s904_s0 + $0x38] sm:$0xff]   ;;  %v662_v17 = vld [vmem:[%s904_s0 + $0x84] sm:$0xff]   ;;  %v666_v20 = vld [vmem:[%s904_s0 + $0x94] ss:$0 sps:$4 sm:$0x77]  }
   0x7   :  { %234 = vmatpush1.bf16.msra.mxu1 %v650_v4  ;;  %114 = vmatprep.subr.bf16.mxu0 %v690_v0  ;;  %v665_v18 = vld [vmem:[%s904_s0 + $0x48] ss:$0 sps:$4 sm:$0x77]   ;;  %v663_v19 = vld [vmem:[%s904_s0 + $0x40] sm:$0xff]   ;;  %v664_v21 = vld [vmem:[%s904_s0 + $0x8c] sm:$0xff]   ;;  %v229_v23 = vsel %vm106_vm1, %v666_v20, 0 }
   0x8   :  { %235 = vmatprep.subr.bf16.mxu1 %v690_v0  ;;  %584 = vmatprep.mubr.msk.bf16.mxu1 %vm102_vm0, %v667_v13  ;;  %v108_v22 = vsel %vm106_vm1, %v665_v18, 0  ;;  %v802_v24 = vld [vmem:[%s905_s1] ss:$8 sps:$4 sm:$0xff]   ;;  %v670_v25 = vld [vmem:[%s904_s0 + $0x98] sm:$0xff]   ;;  %v673_v30 = vld [vmem:[%s904_s0 + $0xec] sm:$0xff]  }
   0x9   :  { %v671_v26 = vld [vmem:[%s904_s0 + $0xe4] sm:$0xff]   ;;  %v675_v32 = vld [vmem:[%s904_s0 + $0xf4] sm:$0xff]   ;;  %v677_v34 = vld [vmem:[%s904_s0 + $0xfc] sm:$0xff]  }
   0xa   :  { %115 = vmatpush1.bf16.msra.mxu0 %v651_v5  ;;  %v520_v27 = vld [vmem:[%s906_s2] sm:$0xff]  ;;  %v521_v29 = vld [vmem:[%s906_s2 + $0x8] sm:$0xff]  ;;  %v676_v33 = vld [vmem:[%s904_s0 + $0xb0] sm:$0xff]  }
   0xb   :  { %236 = vmatpush1.bf16.msra.mxu1 %v652_v6  ;;  %116 = vmatprep.subr.bf16.mxu0 %v690_v0  ;;  %v672_v28 = vld [vmem:[%s904_s0 + $0xa0] sm:$0xff]   ;;  %v674_v31 = vld [vmem:[%s904_s0 + $0xa8] sm:$0xff]   ;;  %v678_v35 = vld [vmem:[%s904_s0 + $0xb8] sm:$0xff]  }
   0xc   :  { %237 = vmatprep.subr.bf16.mxu1 %v690_v0  ;;  %524 = vperm.xlu0 %646, %v520_v27   ;;  %v679_v36 = vld [vmem:[%s904_s0 + $0x104] sm:$0xff]   ;;  %v681_v38 = vld [vmem:[%s904_s0 + $0x10c] sm:$0xff]   ;;  %v683_v40 = vld [vmem:[%s904_s0 + $0x114] sm:$0xff]  }
   0xd   :  { %v680_v37 = vld [vmem:[%s904_s0 + $0xc0] sm:$0xff]   ;;  %v682_v39 = vld [vmem:[%s904_s0 + $0xc8] sm:$0xff]   ;;  %v684_v41 = vld [vmem:[%s904_s0 + $0xd0] sm:$0xff]  }
   0xe   :  { %117 = vmatpush1.bf16.msra.mxu0 %v653_v7  ;;  %v685_v42 = vld [vmem:[%s904_s0 + $0x11c] sm:$0xff]   ;;  %v687_v44 = vld [vmem:[%s904_s0 + $0x124] sm:$0xff]   ;;  %v689_v46 = vld [vmem:[%s904_s0 + $0x12c] ss:$0 sps:$4 sm:$0x77]  }
   0xf   :  { %238 = vmatpush1.bf16.msra.mxu1 %v654_v8  ;;  %118 = vmatprep.subr.bf16.mxu0 %v690_v0  ;;  %v686_v43 = vld [vmem:[%s904_s0 + $0xd8] sm:$0xff]   ;;  %v688_v45 = vld [vmem:[%s904_s0 + $0xe0] ss:$0 sps:$4 sm:$0x77]   ;;  %v475_v48 = vsel %vm106_vm1, %v689_v46, 0 }
  0x10   :  { %239 = vmatprep.subr.bf16.mxu1 %v690_v0  ;;  %529 = vperm.xlu0 %646, %v521_v29   ;;  %v352_v47 = vsel %vm106_vm1, %v688_v45, 0 }
  0x12   :  { %119 = vmatpush1.bf16.msra.mxu0 %v655_v9 }
  0x13   :  { %240 = vmatpush1.bf16.msra.mxu1 %v656_v10  ;;  %120 = vmatprep.subr.bf16.mxu0 %v690_v0 }
  0x14   :  { %241 = vmatprep.subr.bf16.mxu1 %v690_v0 }
  0x16   :  { %121 = vmatpush1.bf16.msra.mxu0 %v657_v11 }
  0x17   :  { %242 = vmatpush1.bf16.msra.mxu1 %v658_v12  ;;  %122 = vmatprep.subr.bf16.mxu0 %v690_v0 }
  0x18   :  { %243 = vmatprep.subr.bf16.mxu1 %v690_v0 }
  0x1a   :  { %123 = vmatpush1.bf16.msra.mxu0 %v659_v14 }
  0x1b   :  { %244 = vmatpush1.bf16.msra.mxu1 %v660_v15  ;;  %124 = vmatprep.subr.bf16.mxu0 %v690_v0 }
  0x1c   :  { %245 = vmatprep.subr.bf16.mxu1 %v690_v0 }
  0x1e   :  { %125 = vmatpush1.bf16.msra.mxu0 %v661_v16 }
  0x1f   :  { %246 = vmatpush1.bf16.msra.mxu1 %v662_v17  ;;  %126 = vmatprep.subr.bf16.mxu0 %v690_v0 }
  0x20   :  { %247 = vmatprep.subr.bf16.mxu1 %v690_v0 }
  0x22   :  { %127 = vmatpush1.bf16.msra.mxu0 %v663_v19 }
  0x23   :  { %248 = vmatpush1.bf16.msra.mxu1 %v664_v21  ;;  %128 = vmatprep.subr.bf16.mxu0 %v690_v0 }
  0x24   :  { %249 = vmatprep.subr.bf16.mxu1 %v690_v0 }
  0x26   :  { %129 = vmatpush1.bf16.msra.mxu0 %v108_v22 }
  0x27   :  { %250 = vmatpush1.bf16.msra.mxu1 %v229_v23  ;;  %354 = vmatprep.subr.bf16.mxu0 %v690_v0 }
  0x28   :  { %477 = vmatprep.subr.bf16.mxu1 %v690_v0 }
  0x29   :  { %143 = vmatmul.mubr.bf16.vlgmr.msra.gmra.mrb[0].mxu0 %v802_v24 }
  0x2a   :  { %264 = vmatmul.mubr.bf16.vlgmr.msra.gmra.mrb[0].mxu1 %v802_v24  ;;  %355 = vmatpush1.bf16.msra.mxu0 %v670_v25 }
  0x2b   :  { %478 = vmatpush1.bf16.msra.mxu1 %v671_v26  ;;  %356 = vmatprep.subr.bf16.mxu0 %v690_v0 }
  0x2c   :  { %479 = vmatprep.subr.bf16.mxu1 %v690_v0  ;;  %614 = vmatprep.mubr.msk.bf16.mxu0 %vm102_vm0, %v667_v13 }
  0x2d   :  { %644 = vmatprep.mubr.msk.bf16.mxu1 %vm102_vm0, %v667_v13 }
  0x2e   :  { %357 = vmatpush1.bf16.msra.mxu0 %v672_v28 }
  0x2f   :  { %480 = vmatpush1.bf16.msra.mxu1 %v673_v30  ;;  %358 = vmatprep.subr.bf16.mxu0 %v690_v0 }
  0x30   :  { %481 = vmatprep.subr.bf16.mxu1 %v690_v0 }
  0x32   :  { %359 = vmatpush1.bf16.msra.mxu0 %v674_v31 }
  0x33   :  { %482 = vmatpush1.bf16.msra.mxu1 %v675_v32  ;;  %360 = vmatprep.subr.bf16.mxu0 %v690_v0 }
  0x34   :  { %483 = vmatprep.subr.bf16.mxu1 %v690_v0 }
  0x36   :  { %361 = vmatpush1.bf16.msra.mxu0 %v676_v33 }
  0x37   :  { %484 = vmatpush1.bf16.msra.mxu1 %v677_v34  ;;  %362 = vmatprep.subr.bf16.mxu0 %v690_v0 }
  0x38   :  { %485 = vmatprep.subr.bf16.mxu1 %v690_v0 }
  0x3a   :  { %363 = vmatpush1.bf16.msra.mxu0 %v678_v35 }
  0x3b   :  { %486 = vmatpush1.bf16.msra.mxu1 %v679_v36  ;;  %364 = vmatprep.subr.bf16.mxu0 %v690_v0 }
  0x3c   :  { %487 = vmatprep.subr.bf16.mxu1 %v690_v0 }
  0x3e   :  { %365 = vmatpush1.bf16.msra.mxu0 %v680_v37 }
  0x3f   :  { %488 = vmatpush1.bf16.msra.mxu1 %v681_v38  ;;  %366 = vmatprep.subr.bf16.mxu0 %v690_v0 }
  0x40   :  { %489 = vmatprep.subr.bf16.mxu1 %v690_v0 }
  0x42   :  { %367 = vmatpush1.bf16.msra.mxu0 %v682_v39 }
  0x43   :  { %490 = vmatpush1.bf16.msra.mxu1 %v683_v40  ;;  %368 = vmatprep.subr.bf16.mxu0 %v690_v0 }
  0x44   :  { %491 = vmatprep.subr.bf16.mxu1 %v690_v0 }
  0x46   :  { %369 = vmatpush1.bf16.msra.mxu0 %v684_v41 }
  0x47   :  { %492 = vmatpush1.bf16.msra.mxu1 %v685_v42  ;;  %370 = vmatprep.subr.bf16.mxu0 %v690_v0 }
  0x48   :  { %493 = vmatprep.subr.bf16.mxu1 %v690_v0 }
  0x4a   :  { %371 = vmatpush1.bf16.msra.mxu0 %v686_v43 }
  0x4b   :  { %494 = vmatpush1.bf16.msra.mxu1 %v687_v44  ;;  %372 = vmatprep.subr.bf16.mxu0 %v690_v0 }
  0x4c   :  { %495 = vmatprep.subr.bf16.mxu1 %v690_v0 }
  0x4e   :  { %373 = vmatpush1.bf16.msra.mxu0 %v352_v47 }
  0x4f   :  { %496 = vmatpush1.bf16.msra.mxu1 %v475_v48 }
  0x51   :  { %387 = vmatmul.mubr.bf16.vlgmr.msra.gmra.mrb[4].mxu0 %v802_v24 }
  0x52   :  { %510 = vmatmul.mubr.bf16.vlgmr.msra.gmra.mrb[4].mxu1 %v802_v24 }
  0x8b   :  { %v525_v59 = vpop.permute.xlu0 %524 }
  0x8f   :  { %v530_v9 = vpop.permute.xlu0 %529 }
  0xfc   :  { %v144_v49 = vpop.f32.mrb[0].mxu0 }
  0xfd   :  { %v265_v50 = vpop.f32.mrb[0].mxu1  ;;  %v146_v51 = vpop.f32.mrb[1].mxu0 }
  0xfe   :  { %v272_v52 = vmax.f32 %v144_v49, %v265_v50  ;;  %v267_v53 = vpop.f32.mrb[1].mxu1  ;;  %v147_v54 = vpop.f32.mrb[2].mxu0 }
  0xff   :  { %v268_v55 = vpop.f32.mrb[2].mxu1  ;;  %v149_v56 = vpop.f32.mrb[3].mxu0 }
 0x100   :  { %v273_v57 = vmax.f32 %v147_v54, %v268_v55  ;;  %v270_v58 = vpop.f32.mrb[3].mxu1 }
 0x124   :  { %v388_v60 = vpop.f32.mrb[4].mxu0 }
 0x125   :  { %v395_v61 = vmax.f32 %v272_v52, %v388_v60  ;;  %v511_v62 = vpop.f32.mrb[4].mxu1  ;;  %v390_v63 = vpop.f32.mrb[5].mxu0 }
 0x126   :  { %v513_v0 = vpop.f32.mrb[5].mxu1  ;;  %v391_v1 = vpop.f32.mrb[6].mxu0 }
 0x127   :  { %v518_v2 = vmax.f32 %v395_v61, %v511_v62  ;;  %v396_v3 = vmax.f32 %v273_v57, %v391_v1  ;;  %v514_v4 = vpop.f32.mrb[6].mxu1  ;;  %v393_v5 = vpop.f32.mrb[7].mxu0 }
 0x128   :  { %v516_v6 = vpop.f32.mrb[7].mxu1 }
 0x129   :  { %v532_v7 = vadd.f32 %v525_v59, %v518_v2  ;;  %v519_v8 = vmax.f32 %v396_v3, %v514_v4 }
 0x12b   :  { %v534_v10 = vmax.f32 %v532_v7, 0.0  ;;  %v533_v11 = vadd.f32 %v530_v9, %v519_v8 }
 0x12d   :  { %536 = vst [vmem:[%s907_s3] sm:$0xff] %v534_v10  ;;  %v535_v12 = vmax.f32 %v533_v11, 0.0 }
 0x12f   :  { %537 = vst [vmem:[%s907_s3 + $0x8] sm:$0xff] %v535_v12 }

</bundles_post_ra>
